<compile_context>
chip_gen: v5e
topology: v5e:2x2
jax: 0.10.0
libtpu: 0.0.40
codegen_flags: <defaults>
</compile_context>

<pallas_src>
import functools

import jax
import jax.numpy as jnp
from jax.experimental import pallas as pl
from jax.experimental.pallas import tpu as pltpu

LN_EPS = 1e-5  # PyTorch nn.LayerNorm default


def _prenorm_residual_kernel(x_ref, w1_ref, b1_ref, w2_ref, b2_ref, o_ref, *,
                             gelu_approximate):
    # --- LayerNorm statistics over last dim (D), f32.  gamma/beta have been
    # folded into W1/b1 on the host, so xn feeds the first matmul directly. ---
    x = x_ref[...].astype(jnp.float32)                       # (tm, D)
    mean = jnp.mean(x, axis=-1, keepdims=True)
    centered = x - mean
    var = jnp.mean(centered * centered, axis=-1, keepdims=True)
    xn = centered * jax.lax.rsqrt(var + LN_EPS)

    # --- fn: Linear -> GELU -> Linear.  MXU matmuls with bf16 operands and
    # f32 accumulation; bias adds and GELU stay in f32. ---
    h = jnp.dot(xn.astype(w1_ref.dtype), w1_ref[...],
                preferred_element_type=jnp.float32) + b1_ref[...]
    # tanh GELU goes to the EUP (own VLIW slot); erf is a long VALU polynomial.
    h = jax.nn.gelu(h, approximate=gelu_approximate)
    out = jnp.dot(h.astype(w2_ref.dtype), w2_ref[...],
                  preferred_element_type=jnp.float32) + b2_ref[...]

    # --- residual add in f32, single cast on store ---
    o_ref[...] = (out + x).astype(o_ref.dtype)
    # NOTE: if a bundle dump shows vreg/VMEM spills at tm=256-512, re-read
    # x_ref[...] here instead of keeping the f32 x live across both matmuls.


def _round_up(a, b):
    return (a + b - 1) // b * b


def _vmem_capacity_bytes():
    try:
        return int(pltpu.get_tpu_info().vmem_capacity_bytes)
    except Exception:
        return 64 << 20  # conservative: v7x per-TensorCore VMEM


def _footprint_bytes(tm, D, H, io_bytes, w_bytes, n_w_buffers):
    """Rough VMEM footprint for one grid step (tiles + weights + temporaries)."""
    tiles = 2 * tm * D * io_bytes                      # x + out, double-buffered
    weights = n_w_buffers * (2 * D * H * w_bytes       # W1 + W2
                             + 8 * (H + D) * 4)        # biases (sublane-padded)
    temps = tm * (4 * D + 3 * H) * 4                   # xn/casts/h/out, f32
    return tiles + weights + temps


def _choose_tm(M, D, H, io_bytes, w_bytes, n_w_buffers, budget):
    if M < 8:
        return M  # block equal to the full (tiny) row dim

    def fits(t):
        return _footprint_bytes(t, D, H, io_bytes, w_bytes,
                                n_w_buffers) + (4 << 20) <= budget

    cands = (512, 256, 128, 64, 32, 16, 8)
    # 1) Largest tile that divides M exactly (no ragged block), gives >= 2 grid
    #    steps (overlap / 2 TCs on v7x) and fits the VMEM budget.
    for c in cands:
        if M % c == 0 and M >= 2 * c and fits(c):
            return c
    # 2) Largest tile with >= 2 steps that fits (ragged last block is handled
    #    by Pallas padded-read / masked-write; rows are independent).
    for c in cands:
        if M >= 2 * c and fits(c):
            return c
    # 3) Tiny M: single grid step covering all rows (biggest tile that fits).
    top = _round_up(M, 8)
    for c in cands:
        if c <= top and fits(c):
            return c
    return 8


def prenorm_residual(x, gamma, beta, w1, b1, w2, b2, *, tm=None,
                     matmul_dtype=jnp.bfloat16, gelu_approximate=True,
                     single_buffer_weights=True, out_dtype=None):
    """Fused LayerNorm -> Linear -> GELU -> Linear + residual.

    x may be f32 or bf16; the output dtype follows x (or `out_dtype`), so
    bf16-activation models get bf16 HBM I/O.  Call eagerly (not under jit) if
    you want the automatic pipeline_mode fallback to be able to trigger.
    """
    *lead, D = x.shape
    H = w1.shape[1]
    M = 1
    for s in lead:
        M *= s
    out_dtype = x.dtype if out_dtype is None else jnp.dtype(out_dtype)

    io_bytes = jnp.dtype(x.dtype).itemsize + jnp.dtype(out_dtype).itemsize
    w_bytes = jnp.dtype(matmul_dtype).itemsize
    n_w_buffers = 1 if single_buffer_weights else 2

    # VMEM budget: physical capacity minus headroom for compiler scratch,
    # semaphores and internal buffers (never request all of v7x's 64 MiB).
    budget = max(32 << 20, _vmem_capacity_bytes() - (12 << 20))

    # Guard the weights-resident assumption (hits v7x's 64 MiB first).
    if _footprint_bytes(8, D, H, io_bytes, w_bytes, n_w_buffers) + (4 << 20) > budget:
        # TODO(synk): add an inner "arbitrary" grid axis over H with an f32
        # (tm, D) VMEM accumulator (pl.when init/finalize) for large D*H.
        raise ValueError(
            f"W1/W2 for D={D}, H={H} do not fit the VMEM budget ({budget} B); "
            "an H-split accumulator variant is required.")

    if tm is None:
        tm = _choose_tm(M, D, H, io_bytes, w_bytes, n_w_buffers, budget)
    grid = (pl.cdiv(M, tm),)

    # No padding / slicing: Pallas masks the ragged last block if tm ∤ M.
    x2d = x.reshape(M, D)

    # Fold gamma into W1 (scale rows, f32) and beta into b1 (beta @ W1), then
    # cast matmul operands to bf16.  One-time wrapper math, zero runtime cost.
    gamma_f = jnp.asarray(gamma, jnp.float32).reshape(D)
    beta_f = jnp.asarray(beta, jnp.float32).reshape(D)
    w1_f = jnp.asarray(w1, jnp.float32)
    w1_c = (gamma_f[:, None] * w1_f).astype(matmul_dtype)
    b1_2 = (jnp.asarray(b1, jnp.float32) + beta_f @ w1_f).reshape(1, H)
    w2_c = jnp.asarray(w2).astype(matmul_dtype)
    b2_2 = jnp.asarray(b2, jnp.float32).reshape(1, D)

    kernel = functools.partial(_prenorm_residual_kernel,
                               gelu_approximate=gelu_approximate)

    def build(n_w_buf):
        vmem_limit = int(max(
            32 << 20,
            min(_footprint_bytes(tm, D, H, io_bytes, w_bytes, n_w_buf) + (8 << 20),
                budget)))
        # Grid-invariant operands: single-buffer them (they are DMA'd once
        # anyway because their index_map is constant; extra buffers only cost
        # VMEM).  n_w_buf == 2 falls back to the default double-buffering.
        wmode = {"pipeline_mode": pl.Buffered(1)} if n_w_buf == 1 else {}
        return pl.pallas_call(
            kernel,
            out_shape=jax.ShapeDtypeStruct((M, D), out_dtype),
            grid_spec=pltpu.PrefetchScalarGridSpec(
                num_scalar_prefetch=0,
                grid=grid,
                in_specs=[
                    pl.BlockSpec((tm, D), lambda i: (i, 0)),            # x rows
                    pl.BlockSpec((D, H), lambda i: (0, 0), **wmode),    # gamma*W1
                    pl.BlockSpec((1, H), lambda i: (0, 0), **wmode),    # b1+beta@W1
                    pl.BlockSpec((H, D), lambda i: (0, 0), **wmode),    # W2
                    pl.BlockSpec((1, D), lambda i: (0, 0), **wmode),    # b2
                ],
                out_specs=pl.BlockSpec((tm, D), lambda i: (i, 0)),
            ),
            compiler_params=pltpu.CompilerParams(
                dimension_semantics=("parallel",),
                vmem_limit_bytes=vmem_limit),
        )

    args = (x2d, w1_c, b1_2, w2_c, b2_2)
    if single_buffer_weights:
        try:
            out2d = build(1)(*args)
        except Exception:
            # pipeline_mode=pl.Buffered(1) unsupported on this jax version (or
            # called under jit): fall back to default double-buffered weights.
            out2d = build(2)(*args)
    else:
        out2d = build(2)(*args)

    return out2d.reshape(*lead, D) if lead else out2d.reshape(D)


if __name__ == "__main__":
    # Small shapes: batch=2, tokens=8, dim=128, hidden=256  ->  x: [2, 8, 128]
    B, N, D, H = 2, 8, 128, 256

    key = jax.random.PRNGKey(0)
    kx, kg, kb, kw1, kb1, kw2, kb2 = jax.random.split(key, 7)

    x = jax.random.normal(kx, (B, N, D), dtype=jnp.float32)

    # LayerNorm params, stored 1-D like PyTorch; non-trivial to exercise the fold.
    gamma = 1.0 + 0.05 * jax.random.normal(kg, (D,), dtype=jnp.float32)
    beta = 0.02 * jax.random.normal(kb, (D,), dtype=jnp.float32)

    # FeedForward params (deterministic synthetic init), 1-D biases like nn.Linear.
    w1 = jax.random.normal(kw1, (D, H), dtype=jnp.float32) * (1.0 / jnp.sqrt(D))
    b1 = jax.random.normal(kb1, (H,), dtype=jnp.float32) * 0.01
    w2 = jax.random.normal(kw2, (H, D), dtype=jnp.float32) * (1.0 / jnp.sqrt(H))
    b2 = jax.random.normal(kb2, (D,), dtype=jnp.float32) * 0.01

    out = prenorm_residual(x, gamma, beta, w1, b1, w2, b2)
    jax.block_until_ready(out)

    # Pure-JAX reference replicating the kernel's math exactly (gamma/beta fold,
    # bf16 matmul operands with f32 accumulation, tanh GELU).
    def ref(x):
        xf = x.astype(jnp.float32)
        mean = jnp.mean(xf, axis=-1, keepdims=True)
        var = jnp.mean((xf - mean) ** 2, axis=-1, keepdims=True)
        xn = (xf - mean) * jax.lax.rsqrt(var + LN_EPS)
        w1f = gamma[:, None] * w1
        b1f = b1 + beta @ w1
        h = jnp.dot(xn.astype(jnp.bfloat16), w1f.astype(jnp.bfloat16),
                    preferred_element_type=jnp.float32) + b1f
        h = jax.nn.gelu(h, approximate=True)
        o = jnp.dot(h.astype(jnp.bfloat16), w2.astype(jnp.bfloat16),
                    preferred_element_type=jnp.float32) + b2
        return (o + xf).astype(x.dtype)

    expected = ref(x)
    assert out.shape == expected.shape
    assert bool(jnp.all(jnp.isfinite(out))), "non-finite output"
    assert jnp.allclose(out, expected, atol=5e-3, rtol=5e-3), "mismatch vs reference"
    print("KERNEL_OK")
</pallas_src>

<mosaic_0001>
module attributes {stable_mosaic.version = 11 : i64} {
  func.func @_prenorm_residual_kernel(%arg0: i32, %arg1: memref<8x128xf32, #tpu.memory_space<vmem>>, %arg2: memref<128x256xbf16, #tpu.memory_space<vmem>>, %arg3: memref<1x256xf32, #tpu.memory_space<vmem>>, %arg4: memref<256x128xbf16, #tpu.memory_space<vmem>>, %arg5: memref<1x128xf32, #tpu.memory_space<vmem>>, %arg6: memref<8x128xf32, #tpu.memory_space<vmem>>) attributes {dimension_semantics = [#tpu.dimension_semantics<parallel>], iteration_bounds = array<i64: 2>, scalar_prefetch = 0 : i64, scratch_operands = 0 : i64, tpu.core_type = #tpu.core_type<tc>, window_params = [{transform_indices = @transform_0, window_bounds = array<i64: 8, 128>}, {pipeline_mode = #tpu.pipeline_mode<synchronous>, transform_indices = @transform_1, window_bounds = array<i64: 128, 256>}, {pipeline_mode = #tpu.pipeline_mode<synchronous>, transform_indices = @transform_2, window_bounds = array<i64: 1, 256>}, {pipeline_mode = #tpu.pipeline_mode<synchronous>, transform_indices = @transform_3, window_bounds = array<i64: 256, 128>}, {pipeline_mode = #tpu.pipeline_mode<synchronous>, transform_indices = @transform_4, window_bounds = array<i64: 1, 128>}, {transform_indices = @transform_5, window_bounds = array<i64: 8, 128>}]} {
    %c0 = arith.constant 0 : index
    %c0_0 = arith.constant 0 : index
    %0 = vector.load %arg1[%c0, %c0_0] : memref<8x128xf32, #tpu.memory_space<vmem>>, vector<8x128xf32>
    %cst = arith.constant dense<0.000000e+00> : vector<8xf32>
    %1 = vector.multi_reduction <add>, %0, %cst [1] : vector<8x128xf32> to vector<8xf32>
    %2 = vector.shape_cast %1 : vector<8xf32> to vector<8x1xf32>
    %cst_1 = arith.constant 1.280000e+02 : f32
    %3 = vector.broadcast %cst_1 : f32 to vector<8x1xf32>
    %4 = arith.divf %2, %3 : vector<8x1xf32>
    %5 = vector.broadcast %4 : vector<8x1xf32> to vector<8x128xf32>
    %6 = arith.subf %0, %5 : vector<8x128xf32>
    %7 = arith.mulf %6, %6 : vector<8x128xf32>
    %cst_2 = arith.constant dense<0.000000e+00> : vector<8xf32>
    %8 = vector.multi_reduction <add>, %7, %cst_2 [1] : vector<8x128xf32> to vector<8xf32>
    %9 = vector.shape_cast %8 : vector<8xf32> to vector<8x1xf32>
    %cst_3 = arith.constant 1.280000e+02 : f32
    %10 = vector.broadcast %cst_3 : f32 to vector<8x1xf32>
    %11 = arith.divf %9, %10 : vector<8x1xf32>
    %cst_4 = arith.constant 9.99999974E-6 : f32
    %12 = vector.broadcast %cst_4 : f32 to vector<8x1xf32>
    %13 = arith.addf %11, %12 : vector<8x1xf32>
    %14 = math.rsqrt %13 : vector<8x1xf32>
    %15 = vector.broadcast %14 : vector<8x1xf32> to vector<8x128xf32>
    %16 = arith.mulf %6, %15 : vector<8x128xf32>
    %17 = arith.truncf %16 : vector<8x128xf32> to vector<8x128xbf16>
    %c0_5 = arith.constant 0 : index
    %c0_6 = arith.constant 0 : index
    %18 = vector.load %arg2[%c0_5, %c0_6] : memref<128x256xbf16, #tpu.memory_space<vmem>>, vector<128x256xbf16>
    %cst_7 = arith.constant dense<0.000000e+00> : vector<8x256xf32>
    %19 = tpu.matmul %17, %18, %cst_7 {dimension_numbers = #tpu.dot_dimension_numbers<[1], [0], [0], [1], [0, 0, 1, 1], [], []>} : vector<8x128xbf16>, vector<128x256xbf16>, vector<8x256xf32> -> vector<8x256xf32>
    %c0_8 = arith.constant 0 : index
    %c0_9 = arith.constant 0 : index
    %20 = vector.load %arg3[%c0_8, %c0_9] : memref<1x256xf32, #tpu.memory_space<vmem>>, vector<1x256xf32>
    %21 = vector.broadcast %20 : vector<1x256xf32> to vector<8x256xf32>
    %22 = arith.addf %19, %21 : vector<8x256xf32>
    %23 = arith.mulf %22, %22 : vector<8x256xf32>
    %24 = arith.mulf %22, %23 : vector<8x256xf32>
    %cst_10 = arith.constant 4.471500e-02 : f32
    %25 = vector.broadcast %cst_10 : f32 to vector<8x256xf32>
    %26 = arith.mulf %25, %24 : vector<8x256xf32>
    %27 = arith.addf %22, %26 : vector<8x256xf32>
    %cst_11 = arith.constant 0.797884583 : f32
    %28 = vector.broadcast %cst_11 : f32 to vector<8x256xf32>
    %29 = arith.mulf %28, %27 : vector<8x256xf32>
    %30 = math.tanh %29 : vector<8x256xf32>
    %cst_12 = arith.constant 1.000000e+00 : f32
    %31 = vector.broadcast %cst_12 : f32 to vector<8x256xf32>
    %32 = arith.addf %31, %30 : vector<8x256xf32>
    %cst_13 = arith.constant 5.000000e-01 : f32
    %33 = vector.broadcast %cst_13 : f32 to vector<8x256xf32>
    %34 = arith.mulf %33, %32 : vector<8x256xf32>
    %35 = arith.mulf %22, %34 : vector<8x256xf32>
    %36 = arith.truncf %35 : vector<8x256xf32> to vector<8x256xbf16>
    %c0_14 = arith.constant 0 : index
    %c0_15 = arith.constant 0 : index
    %37 = vector.load %arg4[%c0_14, %c0_15] : memref<256x128xbf16, #tpu.memory_space<vmem>>, vector<256x128xbf16>
    %cst_16 = arith.constant dense<0.000000e+00> : vector<8x128xf32>
    %38 = tpu.matmul %36, %37, %cst_16 {dimension_numbers = #tpu.dot_dimension_numbers<[1], [0], [0], [1], [0, 0, 1, 1], [], []>} : vector<8x256xbf16>, vector<256x128xbf16>, vector<8x128xf32> -> vector<8x128xf32>
    %c0_17 = arith.constant 0 : index
    %c0_18 = arith.constant 0 : index
    %39 = vector.load %arg5[%c0_17, %c0_18] : memref<1x128xf32, #tpu.memory_space<vmem>>, vector<1x128xf32>
    %40 = vector.broadcast %39 : vector<1x128xf32> to vector<8x128xf32>
    %41 = arith.addf %38, %40 : vector<8x128xf32>
    %42 = arith.addf %41, %0 : vector<8x128xf32>
    %c0_19 = arith.constant 0 : index
    %c0_20 = arith.constant 0 : index
    %43 = vector.load %arg6[%c0_19, %c0_20] : memref<8x128xf32, #tpu.memory_space<vmem>>, vector<8x128xf32>
    tpu.vector_store %arg6[%c0_19, %c0_20], %42 {strides = array<i32>} : memref<8x128xf32, #tpu.memory_space<vmem>>, vector<8x128xf32>,
    return
  }
  func.func @transform_0(%arg0: i32) -> (i32, i32) {
    %c0_i32 = arith.constant 0 : i32
    %c0_i32_0 = arith.constant 0 : i32
    return %arg0, %c0_i32 : i32, i32
  }
  func.func @transform_1(%arg0: i32) -> (i32, i32) {
    %c0_i32 = arith.constant 0 : i32
    %c0_i32_0 = arith.constant 0 : i32
    %c0_i32_1 = arith.constant 0 : i32
    return %c0_i32, %c0_i32_0 : i32, i32
  }
  func.func @transform_2(%arg0: i32) -> (i32, i32) {
    %c0_i32 = arith.constant 0 : i32
    %c0_i32_0 = arith.constant 0 : i32
    %c0_i32_1 = arith.constant 0 : i32
    return %c0_i32, %c0_i32_0 : i32, i32
  }
  func.func @transform_3(%arg0: i32) -> (i32, i32) {
    %c0_i32 = arith.constant 0 : i32
    %c0_i32_0 = arith.constant 0 : i32
    %c0_i32_1 = arith.constant 0 : i32
    return %c0_i32, %c0_i32_0 : i32, i32
  }
  func.func @transform_4(%arg0: i32) -> (i32, i32) {
    %c0_i32 = arith.constant 0 : i32
    %c0_i32_0 = arith.constant 0 : i32
    %c0_i32_1 = arith.constant 0 : i32
    return %c0_i32, %c0_i32_0 : i32, i32
  }
  func.func @transform_5(%arg0: i32) -> (i32, i32) {
    %c0_i32 = arith.constant 0 : i32
    %c0_i32_0 = arith.constant 0 : i32
    return %arg0, %c0_i32 : i32, i32
  }
}

module attributes {stable_mosaic.version = 11 : i64} {
  func.func @_prenorm_residual_kernel(%arg0: i32, %arg1: memref<8x128xf32, #tpu.memory_space<vmem>>, %arg2: memref<128x256xbf16, #tpu.memory_space<vmem>>, %arg3: memref<1x256xf32, #tpu.memory_space<vmem>>, %arg4: memref<256x128xbf16, #tpu.memory_space<vmem>>, %arg5: memref<1x128xf32, #tpu.memory_space<vmem>>, %arg6: memref<8x128xf32, #tpu.memory_space<vmem>>) attributes {dimension_semantics = [#tpu.dimension_semantics<parallel>], iteration_bounds = array<i64: 2>, scalar_prefetch = 0 : i64, scratch_operands = 0 : i64, tpu.core_type = #tpu.core_type<tc>, window_params = [{transform_indices = @transform_0, window_bounds = array<i64: 8, 128>}, {pipeline_mode = #tpu.pipeline_mode<synchronous>, transform_indices = @transform_1, window_bounds = array<i64: 128, 256>}, {pipeline_mode = #tpu.pipeline_mode<synchronous>, transform_indices = @transform_2, window_bounds = array<i64: 1, 256>}, {pipeline_mode = #tpu.pipeline_mode<synchronous>, transform_indices = @transform_3, window_bounds = array<i64: 256, 128>}, {pipeline_mode = #tpu.pipeline_mode<synchronous>, transform_indices = @transform_4, window_bounds = array<i64: 1, 128>}, {transform_indices = @transform_5, window_bounds = array<i64: 8, 128>}]} {
    %c0 = arith.constant 0 : index
    %c0_0 = arith.constant 0 : index
    %0 = vector.load %arg1[%c0, %c0_0] : memref<8x128xf32, #tpu.memory_space<vmem>>, vector<8x128xf32>
    %cst = arith.constant dense<0.000000e+00> : vector<8xf32>
    %1 = vector.multi_reduction <add>, %0, %cst [1] : vector<8x128xf32> to vector<8xf32>
    %2 = vector.shape_cast %1 : vector<8xf32> to vector<8x1xf32>
    %cst_1 = arith.constant 1.280000e+02 : f32
    %3 = vector.broadcast %cst_1 : f32 to vector<8x1xf32>
    %4 = arith.divf %2, %3 : vector<8x1xf32>
    %5 = vector.broadcast %4 : vector<8x1xf32> to vector<8x128xf32>
    %6 = arith.subf %0, %5 : vector<8x128xf32>
    %7 = arith.mulf %6, %6 : vector<8x128xf32>
    %cst_2 = arith.constant dense<0.000000e+00> : vector<8xf32>
    %8 = vector.multi_reduction <add>, %7, %cst_2 [1] : vector<8x128xf32> to vector<8xf32>
    %9 = vector.shape_cast %8 : vector<8xf32> to vector<8x1xf32>
    %cst_3 = arith.constant 1.280000e+02 : f32
    %10 = vector.broadcast %cst_3 : f32 to vector<8x1xf32>
    %11 = arith.divf %9, %10 : vector<8x1xf32>
    %cst_4 = arith.constant 9.99999974E-6 : f32
    %12 = vector.broadcast %cst_4 : f32 to vector<8x1xf32>
    %13 = arith.addf %11, %12 : vector<8x1xf32>
    %14 = math.rsqrt %13 : vector<8x1xf32>
    %15 = vector.broadcast %14 : vector<8x1xf32> to vector<8x128xf32>
    %16 = arith.mulf %6, %15 : vector<8x128xf32>
    %17 = arith.truncf %16 : vector<8x128xf32> to vector<8x128xbf16>
    %c0_5 = arith.constant 0 : index
    %c0_6 = arith.constant 0 : index
    %18 = vector.load %arg2[%c0_5, %c0_6] : memref<128x256xbf16, #tpu.memory_space<vmem>>, vector<128x256xbf16>
    %cst_7 = arith.constant dense<0.000000e+00> : vector<8x256xf32>
    %19 = tpu.matmul %17, %18, %cst_7 {dimension_numbers = #tpu.dot_dimension_numbers<[1], [0], [0], [1], [0, 0, 1, 1], [], []>} : vector<8x128xbf16>, vector<128x256xbf16>, vector<8x256xf32> -> vector<8x256xf32>
    %c0_8 = arith.constant 0 : index
    %c0_9 = arith.constant 0 : index
    %20 = vector.load %arg3[%c0_8, %c0_9] : memref<1x256xf32, #tpu.memory_space<vmem>>, vector<1x256xf32>
    %21 = vector.broadcast %20 : vector<1x256xf32> to vector<8x256xf32>
    %22 = arith.addf %19, %21 : vector<8x256xf32>
    %23 = arith.mulf %22, %22 : vector<8x256xf32>
    %24 = arith.mulf %22, %23 : vector<8x256xf32>
    %cst_10 = arith.constant 4.471500e-02 : f32
    %25 = vector.broadcast %cst_10 : f32 to vector<8x256xf32>
    %26 = arith.mulf %25, %24 : vector<8x256xf32>
    %27 = arith.addf %22, %26 : vector<8x256xf32>
    %cst_11 = arith.constant 0.797884583 : f32
    %28 = vector.broadcast %cst_11 : f32 to vector<8x256xf32>
    %29 = arith.mulf %28, %27 : vector<8x256xf32>
    %30 = math.tanh %29 : vector<8x256xf32>
    %cst_12 = arith.constant 1.000000e+00 : f32
    %31 = vector.broadcast %cst_12 : f32 to vector<8x256xf32>
    %32 = arith.addf %31, %30 : vector<8x256xf32>
    %cst_13 = arith.constant 5.000000e-01 : f32
    %33 = vector.broadcast %cst_13 : f32 to vector<8x256xf32>
    %34 = arith.mulf %33, %32 : vector<8x256xf32>
    %35 = arith.mulf %22, %34 : vector<8x256xf32>
    %36 = arith.truncf %35 : vector<8x256xf32> to vector<8x256xbf16>
    %c0_14 = arith.constant 0 : index
    %c0_15 = arith.constant 0 : index
    %37 = vector.load %arg4[%c0_14, %c0_15] : memref<256x128xbf16, #tpu.memory_space<vmem>>, vector<256x128xbf16>
    %cst_16 = arith.constant dense<0.000000e+00> : vector<8x128xf32>
    %38 = tpu.matmul %36, %37, %cst_16 {dimension_numbers = #tpu.dot_dimension_numbers<[1], [0], [0], [1], [0, 0, 1, 1], [], []>} : vector<8x256xbf16>, vector<256x128xbf16>, vector<8x128xf32> -> vector<8x128xf32>
    %c0_17 = arith.constant 0 : index
    %c0_18 = arith.constant 0 : index
    %39 = vector.load %arg5[%c0_17, %c0_18] : memref<1x128xf32, #tpu.memory_space<vmem>>, vector<1x128xf32>
    %40 = vector.broadcast %39 : vector<1x128xf32> to vector<8x128xf32>
    %41 = arith.addf %38, %40 : vector<8x128xf32>
    %42 = arith.addf %41, %0 : vector<8x128xf32>
    %c0_19 = arith.constant 0 : index
    %c0_20 = arith.constant 0 : index
    %43 = vector.load %arg6[%c0_19, %c0_20] : memref<8x128xf32, #tpu.memory_space<vmem>>, vector<8x128xf32>
    tpu.vector_store %arg6[%c0_19, %c0_20], %42 {strides = array<i32>} : memref<8x128xf32, #tpu.memory_space<vmem>>, vector<8x128xf32>,
    return
  }
  func.func @transform_0(%arg0: i32) -> (i32, i32) {
    %c0_i32 = arith.constant 0 : i32
    %c0_i32_0 = arith.constant 0 : i32
    return %arg0, %c0_i32 : i32, i32
  }
  func.func @transform_1(%arg0: i32) -> (i32, i32) {
    %c0_i32 = arith.constant 0 : i32
    %c0_i32_0 = arith.constant 0 : i32
    %c0_i32_1 = arith.constant 0 : i32
    return %c0_i32, %c0_i32_0 : i32, i32
  }
  func.func @transform_2(%arg0: i32) -> (i32, i32) {
    %c0_i32 = arith.constant 0 : i32
    %c0_i32_0 = arith.constant 0 : i32
    %c0_i32_1 = arith.constant 0 : i32
    return %c0_i32, %c0_i32_0 : i32, i32
  }
  func.func @transform_3(%arg0: i32) -> (i32, i32) {
    %c0_i32 = arith.constant 0 : i32
    %c0_i32_0 = arith.constant 0 : i32
    %c0_i32_1 = arith.constant 0 : i32
    return %c0_i32, %c0_i32_0 : i32, i32
  }
  func.func @transform_4(%arg0: i32) -> (i32, i32) {
    %c0_i32 = arith.constant 0 : i32
    %c0_i32_0 = arith.constant 0 : i32
    %c0_i32_1 = arith.constant 0 : i32
    return %c0_i32, %c0_i32_0 : i32, i32
  }
  func.func @transform_5(%arg0: i32) -> (i32, i32) {
    %c0_i32 = arith.constant 0 : i32
    %c0_i32_0 = arith.constant 0 : i32
    return %arg0, %c0_i32 : i32, i32
  }
}

</mosaic_0001>

<bundles_post_ra>
// kernel: tpu_custom_call.1
= control target key start
LH: loop header
LB: loop body
LE: loop exit
PB: predicated region body
PF: predicated region fallthrough
CT: control target
= control target key end

     0   :  { %10 = vsyncpa [#allocation3], 0  ;;  %s1418_s0 = inlined_call_operand.hbm [shape: f32[16,128], index: 0, kind: input, shape index: {}]   ;;  %s1419_s1 = inlined_call_operand.hbm [shape: bf16[128,256], index: 1, kind: input, shape index: {}]   ;;  %s1420_s2 = inlined_call_operand.hbm [shape: f32[1,256], index: 2, kind: input, shape index: {}]   ;;  %s1421_s3 = inlined_call_operand.hbm [shape: bf16[256,128], index: 3, kind: input, shape index: {}]   ;;  %s1422_s4 = inlined_call_operand.vmem [shape: f32[1,128], index: 4, kind: input, shape index: {}]   ;;  %s1423_s5 = inlined_call_operand.hbm [shape: f32[16,128], index: 5, kind: output, shape index: {}]  }
   0x1   :  { %12 = vsyncpa [#allocation3 + $0x1], 0 }
   0x2   :  { %13 = vsyncpa [#allocation6], 0 }
   0x3   :  { %14 = vsyncpa [#allocation9], 0 }
   0x4   :  { %15 = vsyncpa [#allocation4], 0 }
   0x5   :  { %17 = vsyncpa [#allocation4 + $0x1], 0  ;;  %s1245_s18 = smov 0   ;;  %s1247_s19 = smov 0  }
   0x6   :  { %s1249_s20 = smov 0   ;;  %s1251_s21 = smov 0  }
   0x7 LB: > { %s175_s24 = sshll.u32 %s1419_s1, 4  ;;  %s1269_s25 = sadd.s32 4294967295, %s1205_s21   ;;  %s1205_s21 = sphi %s1251_s21, %s1434_s21   ;;  %s1201_s20 = sphi %s1249_s20, %s1433_s20   ;;  %s1197_s19 = sphi %s1247_s19, %s1432_s19   ;;  %s1193_s18 = sphi %s1245_s18, %s1431_s18   ;;  %s176_s24 = int_to_ptr.hbm [resolvable:$true] %s175_s24 }
   0x8   : > { %p743_p0 = scmp.ge.s32.totalorder %s1205_s21, 1  ;;  %p44_p1 = scmp.eq.s32.totalorder %s1269_s25, 0 }
   0x9   : > { %p164_p2 = scmp.lt.s32.totalorder %s1205_s21, 3  ;;  %s1207_s27 = smov [#allocation5]  }
   0xa   : > { %s177_s28 = sshll.u32 %s1207_s27, 4  ;;  %s190_s6 = sshll.u32 %s1420_s2, 4  ;;  %s178_s28 = int_to_ptr.vmem [resolvable:$true] %s177_s28  ;;  %s191_s6 = int_to_ptr.hbm [resolvable:$true] %s190_s6 }
   0xb   : > { %p1274_p3 = pnand %p743_p0, %p164_p2  ;;  %s201_s10 = sshll.u32 %s1421_s3, 4  ;;  %s202_s10 = int_to_ptr.hbm [resolvable:$true] %s201_s10 }
   0xc   : > { %s1208_s11 = smov [#allocation7]   ;;  %s1209_s13 = smov 128  }
   0xd   : > { %p936_p4 = pneg %p1274_p3  ;;  %s192_s12 = sshll.u32 %s1208_s11, 4  ;;  %s193_s12 = int_to_ptr.vmem [resolvable:$true] %s192_s12 }
   0xe   : > { %s1210_s14 = smov 8   ;;  %s1211_s15 = smov [#allocation8]  }
   0xf   : > { %p1286_p6 = pnand %p936_p4, %p44_p1  ;;  %s203_s16 = sshll.u32 %s1211_s15, 4  ;;  %s204_s16 = int_to_ptr.vmem [resolvable:$true] %s203_s16 }
  0x10   : > { %s1212_s17 = smov 64   ;;  %s1213_s22 = smov 4  }
  0x11   : > { %939 = dma.hbm_to_vmem [thread:$0]  (!%p1286_p6), %s176_s24, 2048, %s178_s28, [#allocation6], %s1209_s13, %s1209_s13, %s1210_s14  }
  0x12   : > { %942 = dma.hbm_to_vmem [thread:$0]  (!%p1286_p6), %s191_s6, 32, %s193_s12, [#allocation6]  }
  0x13   : > { %945 = dma.hbm_to_vmem [thread:$0]  (!%p1286_p6), %s202_s10, 2048, %s204_s16, [#allocation9], %s1212_s17, %s1212_s17, %s1213_s22  }
  0x14   : > { %s742_s23 = sadd.s32 4294967294, %s1205_s21   ;;  %s1301_s24 = sadd.s32 1, %s1205_s21  }
  0x15   : > { %s30_s27 = sadd.s32 1, %s1201_s20  ;;  %s27_s28 = ssub.s32 %s1205_s21, %s1301_s24 }
  0x16   : > { %p37_p7 = scmp.ne.s32.totalorder %s1201_s20, %s1197_s19  ;;  %p28_p8 = scmp.eq.s32.totalorder %s27_s28, 0 }
  0x17   : > { %p38_p9 = scmp.eq.s32.totalorder %s1205_s21, 0  ;;  %p43_p10 = scmp.ne.s32.totalorder %s1197_s19, %s1193_s18 }
  0x18   : > { %p151_p11 = scmp.eq.s32.totalorder %s1269_s25, 1  ;;  %p157_p0 = scmp.eq.s32.totalorder %s742_s23, 1 }
  0x19   : > { %s1313_s29 = scalar_select %p28_p8, %s1201_s20, %s30_s27  }
  0x1a   : > { %p1317_p12 = por %p44_p1, %p43_p10  ;;  %p1321_p13 = por %p151_p11, %p37_p7 }
  0x1b   : > { %p39_p2 = por %p38_p9, %p37_p7  ;;  %s220_s7 = sand.u32 1, %s1201_s20  }
  0x1c   : > { %p1326_p4 = por %p157_p0, %p43_p10  ;;  %p957_p6 = scmp.lt.s32.totalorder %s1205_s21, 2 }
  0x1d   : > { %s748_s9 = sshll.u32 %s220_s7, 3  ;;  %s749_s10 = sshll.u32 %s1205_s21, 3 }
  0x1e   : > { %s228_s13 = scalar_lea.hbm %s1418_s0, %s749_s10  ;;  %s224_s15 = scalar_lea.vmem [#allocation2], %s748_s9 }
  0x1f   : > { %s230_s14 = sshll.u32 %s228_s13, 4  ;;  %s232_s16 = sshll.u32 %s224_s15, 4  ;;  %s231_s14 = int_to_ptr.hbm [resolvable:$true] %s230_s14  ;;  %s233_s16 = int_to_ptr.vmem [resolvable:$true] %s232_s16 }
  0x20   : > { %p1335_p8 = pnand %p957_p6, %p39_p2  ;;  %s221_s22 = scalar_lea.sflag [#allocation3], %s220_s7 }
  0x21   : > { %s1101_s23 = sshra.s32 %s231_s14, 4  ;;  %s1108_s9 = scalar_lea.hbm %s1418_s0, 16  ;;  %s1102_s23 = int_to_ptr.hbm [resolvable:$true] %s1101_s23 }
  0x22   : > { %s1103_s27 = scalar_lea.hbm %s1102_s23, 8  ;;  %p1105_p9 = pneg %p1335_p8 }
  0x23   : > { %p1104_p7 = scmp.ne.s32.totalorder %s1102_s23, %s1103_s27  ;;  %p1109_p0 = scmp.lt.s32.totalorder %s1102_s23, %s1418_s0 }
  0x24   : > { %p1110_p2 = scmp.lt.s32.totalorder %s1108_s9, %s1103_s27 }
  0x25   : > { %p1106_p10 = pnand %p1105_p9, %p1104_p7 }
  0x26   : > { %p1111_p6 = por %p1110_p2, %p1109_p0 }
  0x27   : > { %p1107_p11 = pneg %p1106_p10 }
  0x29   : > { %p1112_p5 = pnand %p1111_p6, %p1107_p11 }
  0x2b   : > { %1115 = shalt.err (!%p1112_p5)
}
  0x2c   : > { %949 = dma.hbm_to_vmem [thread:$0]  (!%p1335_p8), %s231_s14, 128, %s233_s16, %s221_s22  }
  0x2d   : > { %241 = sbr.rel (%p1274_p3) target bundleno = 615 (0x267), region = 40  ;;  %s1352_s7 = sand.u32 (!%p1274_p3), 1, %s1197_s19  }
  0x2e   : > { %s751_s13 = sshll.u32 (!%p1274_p3), %s1352_s7, 3  ;;  %s244_s15 = scalar_lea.sflag (!%p1274_p3), [#allocation3], %s1352_s7 }
  0x2f   : > { %s247_s23 = scalar_lea.vmem (!%p1274_p3), [#allocation2], %s751_s13 }
  0x32   : > { %1176 = dma.done.wait (%p1317_p12), %s244_s15, 128  }
  0x33   : > { %1178 = vsyncadd (%p1317_p12), %s244_s15, 4294967168 }
  0x34   : > { %1180 = dma.done.wait (%p44_p1), [#allocation6], 2080  }
  0x35   : > { %1182 = vsyncadd (%p44_p1), [#allocation6], 4294965216 }
  0x36   : > { %1184 = dma.done.wait (%p44_p1), [#allocation9], 2048  }
  0x37   : > { %1186 = vsyncadd (%p44_p1), [#allocation9], 4294965248  ;;  %v1370_v0 = vld [vmem:[%s247_s23] sm:$0xff]  ;;  %v1214_v1 = vmov 128.0   ;;  %v806_v7 = vld [vmem:[#allocation5 + $0x60] sm:$0xf] }
  0x38   : > { %291 = vadd.xlane.f32.xlu0 %v1370_v0  ;;  %1003 = vrcp.f32 %v1214_v1  ;;  %v814_v2 = vld [vmem:[#allocation5 + $0x70] sm:$0xf]  ;;  %v903_v3 = vld [vmem:[#allocation5 + $0x74] sm:$0xf0]  ;;  %v902_v4 = vld [vmem:[#allocation5 + $0x74] sm:$0xf] }
  0x39   : > { %v815_v5 = vor.u32 %v903_v3, %v814_v2  ;;  %v816_v6 = vld [vmem:[#allocation5 + $0x78] sm:$0xf0]  ;;  %v901_v8 = vld [vmem:[#allocation5 + $0x64] sm:$0xf0]  ;;  %v900_v10 = vld [vmem:[#allocation5 + $0x64] sm:$0xf] }
  0x3a   : > { %v819_v9 = vor.u32 %v902_v4, %v816_v6  ;;  %v808_v11 = vld [vmem:[#allocation5 + $0x68] sm:$0xf0]  ;;  %v807_v12 = vor.u32 %v901_v8, %v806_v7  ;;  %v798_v24 = vld [vmem:[#allocation5 + $0x50] sm:$0xf]  ;;  %v899_v25 = vld [vmem:[#allocation5 + $0x54] sm:$0xf0] }
  0x3b   : > { %421 = vmatpush.bf16.msra.mxu0 %v815_v5  ;;  %v811_v14 = vor.u32 %v900_v10, %v808_v11  ;;  %v898_v26 = vld [vmem:[#allocation5 + $0x54] sm:$0xf]  ;;  %v799_v27 = vor.u32 %v899_v25, %v798_v24  ;;  %v800_v28 = vld [vmem:[#allocation5 + $0x58] sm:$0xf0]  ;;  %v790_v30 = vld [vmem:[#allocation5 + $0x40] sm:$0xf] }
  0x3c   : > { %434 = vmatpush.bf16.msra.mxu1 %v819_v9  ;;  %v803_v29 = vor.u32 %v898_v26, %v800_v28  ;;  %v897_v31 = vld [vmem:[#allocation5 + $0x44] sm:$0xf0]  ;;  %v896_v32 = vld [vmem:[#allocation5 + $0x44] sm:$0xf]  ;;  %v792_v34 = vld [vmem:[#allocation5 + $0x48] sm:$0xf0] }
  0x3d   : > { %v791_v33 = vor.u32 %v897_v31, %v790_v30  ;;  %v795_v35 = vor.u32 %v896_v32, %v792_v34  ;;  %v782_v36 = vld [vmem:[#allocation5 + $0x30] sm:$0xf]  ;;  %v895_v37 = vld [vmem:[#allocation5 + $0x34] sm:$0xf0]  ;;  %v894_v38 = vld [vmem:[#allocation5 + $0x34] sm:$0xf] }
  0x3e   : > { %v1004_v13 = vpop.eup %1003  ;;  %v783_v39 = vor.u32 %v895_v37, %v782_v36  ;;  %v784_v40 = vld [vmem:[#allocation5 + $0x38] sm:$0xf0]  ;;  %v774_v42 = vld [vmem:[#allocation5 + $0x20] sm:$0xf]  ;;  %v893_v43 = vld [vmem:[#allocation5 + $0x24] sm:$0xf0] }
  0x3f   : > { %v294_v15 = vmul.f32 128.0, %v1004_v13  ;;  %422 = vmatpush.bf16.msra.mxu0 %v807_v12  ;;  %vm298_vm0 = vweird.f32 %v1004_v13  ;;  %v787_v41 = vor.u32 %v894_v38, %v784_v40  ;;  %v892_v44 = vld [vmem:[#allocation5 + $0x24] sm:$0xf]  ;;  %v775_v45 = vor.u32 %v893_v43, %v774_v42  ;;  %v776_v46 = vld [vmem:[#allocation5 + $0x28] sm:$0xf0]  ;;  %v911_v60 = vld [vmem:[#allocation8 + $0x38] sm:$0xff] }
  0x40   : > { %435 = vmatpush.bf16.msra.mxu1 %v811_v14  ;;  %v779_v47 = vor.u32 %v892_v44, %v776_v46  ;;  %v766_v48 = vld [vmem:[#allocation5 + $0x10] sm:$0xf]  ;;  %v891_v49 = vld [vmem:[#allocation5 + $0x14] sm:$0xf0]  ;;  %v890_v50 = vld [vmem:[#allocation5 + $0x14] sm:$0xf]  ;;  %599 = vmatpush.bf16.msra.mxu2 %v911_v60 }
  0x41   : > { %v295_v16 = vsub.f32 1.0, %v294_v15  ;;  %v767_v51 = vor.u32 %v891_v49, %v766_v48  ;;  %v768_v52 = vld [vmem:[#allocation5 + $0x18] sm:$0xf0]  ;;  %v758_v53 = vld [vmem:[#allocation5] sm:$0xf]  ;;  %v910_v11 = vld [vmem:[#allocation8 + $0x30] sm:$0xff] }
  0x42   : > { %v889_v54 = vld [vmem:[#allocation5 + $0x4] sm:$0xf0]  ;;  %v771_v55 = vor.u32 %v890_v50, %v768_v52  ;;  %v888_v56 = vld [vmem:[#allocation5 + $0x4] sm:$0xf]  ;;  %v760_v57 = vld [vmem:[#allocation5 + $0x8] sm:$0xf0] }
  0x43   : > { %v296_v17 = vmul.f32 %v1004_v13, %v295_v16  ;;  %423 = vmatpush.bf16.msra.mxu0 %v799_v27  ;;  %v759_v58 = vor.u32 %v889_v54, %v758_v53  ;;  %v763_v59 = vor.u32 %v888_v56, %v760_v57  ;;  %v919_v61 = vld [vmem:[#allocation8 + $0x78] sm:$0xff]  ;;  %v918_v12 = vld [vmem:[#allocation8 + $0x70] sm:$0xff]  ;;  %v917_v14 = vld [vmem:[#allocation8 + $0x68] sm:$0xff]  ;;  %s885_s26 = sshll.u32 %s1269_s25, 3  ;;  %s289_s27 = scalar_lea.vmem [#allocation10], %s751_s13 }
  0x44   : > { %436 = vmatpush.bf16.msra.mxu1 %v803_v29  ;;  %612 = vmatpush.bf16.msra.mxu3 %v919_v61  ;;  %v908_v15 = vld [vmem:[#allocation8 + $0x20] sm:$0xff]  ;;  %v335_v25 = vld [vmem:[#allocation7] sm:$0x3]  ;;  %v1002_v54 = vld [vmem:[%s1422_s4] ss:$0 sm:$0xff]  ;;  %s638_s22 = scalar_lea.hbm %s1423_s5, %s885_s26  ;;  %s640_s28 = sshll.u32 %s289_s27, 4  ;;  %s641_s28 = int_to_ptr.vmem [resolvable:$true] %s640_s28 }
  0x45   : > { %v297_v18 = vadd.f32 %v1004_v13, %v296_v17  ;;  %600 = vmatpush.bf16.msra.mxu2 %v910_v11  ;;  %v916_v16 = vld [vmem:[#allocation8 + $0x60] sm:$0xff]  ;;  %v907_v17 = vld [vmem:[#allocation8 + $0x18] sm:$0xff]  ;;  %v337_v26 = vperm.slane %v335_v25, 0  ;;  %v338_v27 = vperm.slane %v335_v25, 1  ;;  %s642_s10 = sshll.u32 %s638_s22, 4  ;;  %s628_s25 = scalar_lea.sflag [#allocation4], %s1352_s7  ;;  %s643_s10 = int_to_ptr.hbm [resolvable:$true] %s642_s10 }
  0x46   : > { %v912_v24 = vld [vmem:[#allocation8 + $0x40] sm:$0xff]  ;;  %s1145_s9 = sshra.s32 %s643_s10, 4  ;;  %s1151_s13 = scalar_lea.hbm %s1423_s5, 16  ;;  %s1146_s9 = int_to_ptr.hbm [resolvable:$true] %s1145_s9 }
  0x47   : > { %v299_v19 = vsel %vm298_vm0, %v1004_v13, %v297_v18  ;;  %424 = vmatpush.bf16.msra.mxu0 %v791_v33  ;;  %v909_v13 = vld [vmem:[#allocation8 + $0x28] sm:$0xff]  ;;  %v915_v18 = vld [vmem:[#allocation8 + $0x58] sm:$0xff]  ;;  %s1147_s11 = scalar_lea.hbm %s1146_s9, 8  ;;  %p1152_p12 = scmp.lt.s32.totalorder %s1146_s9, %s1423_s5 }
  0x48   : > { %437 = vmatpush.bf16.msra.mxu1 %v795_v35  ;;  %613 = vmatpush.bf16.msra.mxu3 %v918_v12  ;;  %p1148_p1 = scmp.ne.s32.totalorder %s1146_s9, %s1147_s11  ;;  %p1153_p8 = scmp.lt.s32.totalorder %s1151_s13, %s1147_s11 }
  0x49   : > { %601 = vmatpush.bf16.msra.mxu2 %v909_v13 }
  0x4a   : > { %p1149_p3 = pnand %p1148_p1, %p1321_p13  ;;  %p1154_p7 = por %p1153_p8, %p1152_p12 }
  0x4b   : > { %425 = vmatpush.bf16.msra.mxu0 %v783_v39 }
  0x4c   : > { %438 = vmatpush.bf16.msra.mxu1 %v787_v41  ;;  %614 = vmatpush.bf16.msra.mxu3 %v917_v14  ;;  %p1150_p5 = pneg %p1149_p3 }
  0x4d   : > { %602 = vmatpush.bf16.msra.mxu2 %v908_v15 }
  0x4e   : > { %p1155_p9 = pnand %p1154_p7, %p1150_p5 }
  0x4f   : > { %426 = vmatpush.bf16.msra.mxu0 %v775_v45 }
  0x50   : > { %439 = vmatpush.bf16.msra.mxu1 %v779_v47  ;;  %615 = vmatpush.bf16.msra.mxu3 %v916_v16 }
  0x51   : > { %603 = vmatpush.bf16.msra.mxu2 %v907_v17 }
  0x53   : > { %427 = vmatpush.bf16.msra.mxu0 %v767_v51 }
  0x54   : > { %440 = vmatpush.bf16.msra.mxu1 %v771_v55  ;;  %616 = vmatpush.bf16.msra.mxu3 %v915_v18 }
  0x57   : > { %428 = vmatpush.bf16.msra.mxu0 %v759_v58 }
  0x58   : > { %441 = vmatpush.bf16.msra.mxu1 %v763_v59 }
  0xab   : > { %v292_v20 = vpop.xlane.xlu0 %291 }
  0xac   : > { %v300_v21 = vmul.f32 %v299_v19, %v292_v20  ;;  %v914_v20 = vld [vmem:[#allocation8 + $0x50] sm:$0xff] }
  0xad   : > { %617 = vmatpush.bf16.msra.mxu3 %v914_v20 }
  0xae   : > { %v1374_v22 = vsub.f32 %v1370_v0, %v300_v21  ;;  %v905_v21 = vld [vmem:[#allocation8 + $0x8] sm:$0xff] }
  0xb0   : > { %v302_v23 = vmul.f32 %v1374_v22, %v1374_v22 }
  0xb2   : > { %303 = vadd.xlane.f32.xlu0 %v302_v23  ;;  %v904_v23 = vld [vmem:[#allocation8] sm:$0xff] }
 0x125   : > { %v304_v62 = vpop.xlane.xlu0 %303 }
 0x126   : > { %v305_v63 = vmul.f32 %v304_v62, %v299_v19  ;;  %v906_v19 = vld [vmem:[#allocation8 + $0x10] sm:$0xff] }
 0x127   : > { %604 = vmatpush.bf16.msra.mxu2 %v906_v19 }
 0x128   : > { %v306_v1 = vadd.f32 1e-05, %v305_v63 }
 0x12a   : > { %1005 = vrsqrt.f32 %v306_v1  ;;  %vm313_vm2 = vweird.f32 %v306_v1 }
 0x12b   : > { %605 = vmatpush.bf16.msra.mxu2 %v905_v21 }
 0x12f   : > { %606 = vmatpush.bf16.msra.mxu2 %v904_v23 }
 0x130   : > { %v1006_v2 = vpop.eup %1005 }
 0x131   : > { %v308_v3 = vmul.f32 %v1006_v2, %v306_v1  ;;  %vm314_vm1 = vweird.f32 %v1006_v2 }
 0x132   : > { %vm315_vm3 = vmor %vm313_vm2, %vm314_vm1 }
 0x133   : > { %v309_v4 = vmul.f32 %v1006_v2, %v308_v3 }
 0x135   : > { %v310_v5 = vmul.f32 0.5, %v309_v4 }
 0x137   : > { %v311_v6 = vsub.f32 1.5, %v310_v5 }
 0x139   : > { %v312_v7 = vmul.f32 %v1006_v2, %v311_v6 }
 0x13b   : > { %v316_v8 = vsel %vm315_vm3, %v1006_v2, %v312_v7 }
 0x13c   : > { %v317_v9 = vmul.f32 %v316_v8, %v1374_v22  ;;  %v913_v22 = vld [vmem:[#allocation8 + $0x48] sm:$0xff] }
 0x13d   : > { %618 = vmatpush.bf16.msra.mxu3 %v913_v22 }
 0x13e   : > { %v318_v10 = vpack.c.bf16 %v317_v9, %v317_v9 }
 0x140   : > { %429 = vmatmul.bf16.vlgmr.msra.gmra.mxu0 %v318_v10  ;;  %442 = vmatmul.bf16.vlgmr.msra.gmra.mxu1 %v318_v10 }
 0x141   : > { %619 = vmatpush.bf16.msra.mxu3 %v912_v24 }
 0x1bd   : > { %v430_v28 = vpop.f32.mrf.mxu0  ;;  %v443_v29 = vpop.f32.mrf.mxu1 }
 0x1be   : > { %v431_v30 = vadd.f32 %v430_v28, %v337_v26  ;;  %v444_v31 = vadd.f32 %v443_v29, %v338_v27 }
 0x1c0   : > { %v447_v32 = vmul.f32 %v431_v30, %v431_v30  ;;  %v448_v33 = vmul.f32 %v444_v31, %v444_v31 }
 0x1c2   : > { %v449_v34 = vmul.f32 %v447_v32, %v431_v30  ;;  %v450_v35 = vmul.f32 %v448_v33, %v444_v31 }
 0x1c4   : > { %v451_v36 = vmul.f32 0.044715, %v449_v34  ;;  %v452_v37 = vmul.f32 0.044715, %v450_v35 }
 0x1c5   : > { %v432_v38 = vpop.f32.mrf.mxu0  ;;  %v445_v39 = vpop.f32.mrf.mxu1 }
 0x1c6   : > { %v453_v40 = vadd.f32 %v451_v36, %v431_v30  ;;  %v454_v41 = vadd.f32 %v452_v37, %v444_v31 }
 0x1c8   : > { %v455_v42 = vmul.f32 0.7978846, %v453_v40  ;;  %v456_v43 = vmul.f32 0.7978846, %v454_v41 }
 0x1ca   : > { %1007 = vtanh.f32 %v455_v42 }
 0x1cb   : > { %1009 = vtanh.f32 %v456_v43 }
 0x1d0   : > { %v1008_v44 = vpop.eup %1007 }
 0x1d1   : > { %v1010_v45 = vpop.eup %1009  ;;  %v459_v46 = vadd.f32 1.0, %v1008_v44 }
 0x1d2   : > { %v460_v47 = vadd.f32 1.0, %v1010_v45 }
 0x1d3   : > { %v461_v48 = vmul.f32 0.5, %v459_v46 }
 0x1d4   : > { %v462_v49 = vmul.f32 0.5, %v460_v47 }
 0x1d5   : > { %v463_v50 = vmul.f32 %v461_v48, %v431_v30 }
 0x1d6   : > { %v464_v51 = vmul.f32 %v462_v49, %v444_v31 }
 0x1d7   : > { %v465_v52 = vpack.c.bf16 %v463_v50, %v463_v50 }
 0x1d8   : > { %v466_v53 = vpack.c.bf16 %v464_v51, %v464_v51 }
 0x1d9   : > { %607 = vmatmul.bf16.vlgmr.msra.gmra.mxu2 %v465_v52 }
 0x1da   : > { %620 = vmatmul.bf16.vlgmr.msra.gmra.mxu3 %v466_v53 }
 0x25c   : > { %v608_v55 = vpop.f32.mrf.mxu2 }
 0x25d   : > { %v609_v56 = vadd.f32 %v1002_v54, %v608_v55  ;;  %v621_v57 = vpop.f32.mrf.mxu3 }
 0x25f   : > { %v622_v58 = vadd.f32 %v621_v57, %v609_v56 }
 0x261   : > { %v625_v59 = vadd.f32 %v622_v58, %v1370_v0 }
 0x263   : > { %626 = vst [vmem:[%s289_s27] sm:$0xff] %v625_v59 }
 0x264   : > { %v610_v60 = vpop.f32.mrf.mxu2 }
 0x265   : > { %1158 = shalt.err (!%p1155_p9)
}
 0x266   : > { %934 = dma.vmem_to_hbm [thread:$0]  (%p1321_p13), %s641_s28, 128, %s643_s10, %s628_s25   ;;  %v623_v0 = vpop.f32.mrf.mxu3 }
 0x267 PF: > { %s654_s7 = sand.u32 1, %s1193_s18   ;;  %p1430_p10 = scmp.ge.s32.totalorder %s1205_s21, 2 }
 0x268   : > { %s655_s30 = scalar_lea.sflag [#allocation4], %s654_s7 }
 0x269   : > { %p951_p11 = pnand %p1430_p10, %p1326_p4 }
 0x26b   : > { %p952_p0 = pneg %p951_p11 }
 0x26d   : > { %1188 = dma.done.wait (%p952_p0), %s655_s30, 128  }
 0x26e   : > { %1190 = vsyncadd (%p952_p0), %s655_s30, 4294967168  ;;  %p20_p2 = scmp.ge.s32.totalorder %s1301_s24, 4   ;;  %s1431_s18 = smov %s1197_s19 }
 0x26f   : > { %s1432_s19 = smov %s1201_s20  ;;  %s1433_s20 = smov %s1313_s29 }
 0x270   : > { %s1434_s21 = smov %s1301_s24  ;;  %22 = sbr.rel (!%p20_p2) target bundleno = 7 (0x7), region = 97 }
 0x275   :  { %661 = vsyncpa [#allocation3], 1 }
 0x276   :  { %663 = vsyncpa [#allocation3 + $0x1], 1 }
 0x277   :  { %664 = vsyncpa [#allocation6], 1 }
 0x278   :  { %665 = vsyncpa [#allocation9], 1 }
 0x279   :  { %666 = vsyncpa [#allocation4], 1 }
 0x27a   :  { %668 = vsyncpa [#allocation4 + $0x1], 1 }

// kernel: tpu_custom_call.1
= control target key start
LH: loop header
LB: loop body
LE: loop exit
PB: predicated region body
PF: predicated region fallthrough
CT: control target
= control target key end

     0   :  { %10 = vsyncpa [#allocation3], 0  ;;  %s1418_s0 = inlined_call_operand.hbm [shape: f32[16,128], index: 0, kind: input, shape index: {}]   ;;  %s1419_s1 = inlined_call_operand.hbm [shape: bf16[128,256], index: 1, kind: input, shape index: {}]   ;;  %s1420_s2 = inlined_call_operand.hbm [shape: f32[1,256], index: 2, kind: input, shape index: {}]   ;;  %s1421_s3 = inlined_call_operand.hbm [shape: bf16[256,128], index: 3, kind: input, shape index: {}]   ;;  %s1422_s4 = inlined_call_operand.vmem [shape: f32[1,128], index: 4, kind: input, shape index: {}]   ;;  %s1423_s5 = inlined_call_operand.hbm [shape: f32[16,128], index: 5, kind: output, shape index: {}]  }
   0x1   :  { %12 = vsyncpa [#allocation3 + $0x1], 0 }
   0x2   :  { %13 = vsyncpa [#allocation6], 0 }
   0x3   :  { %14 = vsyncpa [#allocation9], 0 }
   0x4   :  { %15 = vsyncpa [#allocation4], 0 }
   0x5   :  { %17 = vsyncpa [#allocation4 + $0x1], 0  ;;  %s1245_s18 = smov 0   ;;  %s1247_s19 = smov 0  }
   0x6   :  { %s1249_s20 = smov 0   ;;  %s1251_s21 = smov 0  }
   0x7 LB: > { %s175_s24 = sshll.u32 %s1419_s1, 4  ;;  %s1269_s25 = sadd.s32 4294967295, %s1205_s21   ;;  %s1205_s21 = sphi %s1251_s21, %s1434_s21   ;;  %s1201_s20 = sphi %s1249_s20, %s1433_s20   ;;  %s1197_s19 = sphi %s1247_s19, %s1432_s19   ;;  %s1193_s18 = sphi %s1245_s18, %s1431_s18   ;;  %s176_s24 = int_to_ptr.hbm [resolvable:$true] %s175_s24 }
   0x8   : > { %p743_p0 = scmp.ge.s32.totalorder %s1205_s21, 1  ;;  %p44_p1 = scmp.eq.s32.totalorder %s1269_s25, 0 }
   0x9   : > { %p164_p2 = scmp.lt.s32.totalorder %s1205_s21, 3  ;;  %s1207_s27 = smov [#allocation5]  }
   0xa   : > { %s177_s28 = sshll.u32 %s1207_s27, 4  ;;  %s190_s6 = sshll.u32 %s1420_s2, 4  ;;  %s178_s28 = int_to_ptr.vmem [resolvable:$true] %s177_s28  ;;  %s191_s6 = int_to_ptr.hbm [resolvable:$true] %s190_s6 }
   0xb   : > { %p1274_p3 = pnand %p743_p0, %p164_p2  ;;  %s201_s10 = sshll.u32 %s1421_s3, 4  ;;  %s202_s10 = int_to_ptr.hbm [resolvable:$true] %s201_s10 }
   0xc   : > { %s1208_s11 = smov [#allocation7]   ;;  %s1209_s13 = smov 128  }
   0xd   : > { %p936_p4 = pneg %p1274_p3  ;;  %s192_s12 = sshll.u32 %s1208_s11, 4  ;;  %s193_s12 = int_to_ptr.vmem [resolvable:$true] %s192_s12 }
   0xe   : > { %s1210_s14 = smov 8   ;;  %s1211_s15 = smov [#allocation8]  }
   0xf   : > { %p1286_p6 = pnand %p936_p4, %p44_p1  ;;  %s203_s16 = sshll.u32 %s1211_s15, 4  ;;  %s204_s16 = int_to_ptr.vmem [resolvable:$true] %s203_s16 }
  0x10   : > { %s1212_s17 = smov 64   ;;  %s1213_s22 = smov 4  }
  0x11   : > { %939 = dma.hbm_to_vmem [thread:$0]  (!%p1286_p6), %s176_s24, 2048, %s178_s28, [#allocation6], %s1209_s13, %s1209_s13, %s1210_s14  }
  0x12   : > { %942 = dma.hbm_to_vmem [thread:$0]  (!%p1286_p6), %s191_s6, 32, %s193_s12, [#allocation6]  }
  0x13   : > { %945 = dma.hbm_to_vmem [thread:$0]  (!%p1286_p6), %s202_s10, 2048, %s204_s16, [#allocation9], %s1212_s17, %s1212_s17, %s1213_s22  }
  0x14   : > { %s742_s23 = sadd.s32 4294967294, %s1205_s21   ;;  %s1301_s24 = sadd.s32 1, %s1205_s21  }
  0x15   : > { %s30_s27 = sadd.s32 1, %s1201_s20  ;;  %s27_s28 = ssub.s32 %s1205_s21, %s1301_s24 }
  0x16   : > { %p37_p7 = scmp.ne.s32.totalorder %s1201_s20, %s1197_s19  ;;  %p28_p8 = scmp.eq.s32.totalorder %s27_s28, 0 }
  0x17   : > { %p38_p9 = scmp.eq.s32.totalorder %s1205_s21, 0  ;;  %p43_p10 = scmp.ne.s32.totalorder %s1197_s19, %s1193_s18 }
  0x18   : > { %p151_p11 = scmp.eq.s32.totalorder %s1269_s25, 1  ;;  %p157_p0 = scmp.eq.s32.totalorder %s742_s23, 1 }
  0x19   : > { %s1313_s29 = scalar_select %p28_p8, %s1201_s20, %s30_s27  }
  0x1a   : > { %p1317_p12 = por %p44_p1, %p43_p10  ;;  %p1321_p13 = por %p151_p11, %p37_p7 }
  0x1b   : > { %p39_p2 = por %p38_p9, %p37_p7  ;;  %s220_s7 = sand.u32 1, %s1201_s20  }
  0x1c   : > { %p1326_p4 = por %p157_p0, %p43_p10  ;;  %p957_p6 = scmp.lt.s32.totalorder %s1205_s21, 2 }
  0x1d   : > { %s748_s9 = sshll.u32 %s220_s7, 3  ;;  %s749_s10 = sshll.u32 %s1205_s21, 3 }
  0x1e   : > { %s228_s13 = scalar_lea.hbm %s1418_s0, %s749_s10  ;;  %s224_s15 = scalar_lea.vmem [#allocation2], %s748_s9 }
  0x1f   : > { %s230_s14 = sshll.u32 %s228_s13, 4  ;;  %s232_s16 = sshll.u32 %s224_s15, 4  ;;  %s231_s14 = int_to_ptr.hbm [resolvable:$true] %s230_s14  ;;  %s233_s16 = int_to_ptr.vmem [resolvable:$true] %s232_s16 }
  0x20   : > { %p1335_p8 = pnand %p957_p6, %p39_p2  ;;  %s221_s22 = scalar_lea.sflag [#allocation3], %s220_s7 }
  0x21   : > { %s1101_s23 = sshra.s32 %s231_s14, 4  ;;  %s1108_s9 = scalar_lea.hbm %s1418_s0, 16  ;;  %s1102_s23 = int_to_ptr.hbm [resolvable:$true] %s1101_s23 }
  0x22   : > { %s1103_s27 = scalar_lea.hbm %s1102_s23, 8  ;;  %p1105_p9 = pneg %p1335_p8 }
  0x23   : > { %p1104_p7 = scmp.ne.s32.totalorder %s1102_s23, %s1103_s27  ;;  %p1109_p0 = scmp.lt.s32.totalorder %s1102_s23, %s1418_s0 }
  0x24   : > { %p1110_p2 = scmp.lt.s32.totalorder %s1108_s9, %s1103_s27 }
  0x25   : > { %p1106_p10 = pnand %p1105_p9, %p1104_p7 }
  0x26   : > { %p1111_p6 = por %p1110_p2, %p1109_p0 }
  0x27   : > { %p1107_p11 = pneg %p1106_p10 }
  0x29   : > { %p1112_p5 = pnand %p1111_p6, %p1107_p11 }
  0x2b   : > { %1115 = shalt.err (!%p1112_p5)
}
  0x2c   : > { %949 = dma.hbm_to_vmem [thread:$0]  (!%p1335_p8), %s231_s14, 128, %s233_s16, %s221_s22  }
  0x2d   : > { %241 = sbr.rel (%p1274_p3) target bundleno = 615 (0x267), region = 40  ;;  %s1352_s7 = sand.u32 (!%p1274_p3), 1, %s1197_s19  }
  0x2e   : > { %s751_s13 = sshll.u32 (!%p1274_p3), %s1352_s7, 3  ;;  %s244_s15 = scalar_lea.sflag (!%p1274_p3), [#allocation3], %s1352_s7 }
  0x2f   : > { %s247_s23 = scalar_lea.vmem (!%p1274_p3), [#allocation2], %s751_s13 }
  0x32   : > { %1176 = dma.done.wait (%p1317_p12), %s244_s15, 128  }
  0x33   : > { %1178 = vsyncadd (%p1317_p12), %s244_s15, 4294967168 }
  0x34   : > { %1180 = dma.done.wait (%p44_p1), [#allocation6], 2080  }
  0x35   : > { %1182 = vsyncadd (%p44_p1), [#allocation6], 4294965216 }
  0x36   : > { %1184 = dma.done.wait (%p44_p1), [#allocation9], 2048  }
  0x37   : > { %1186 = vsyncadd (%p44_p1), [#allocation9], 4294965248  ;;  %v1370_v0 = vld [vmem:[%s247_s23] sm:$0xff]  ;;  %v1214_v1 = vmov 128.0   ;;  %v806_v7 = vld [vmem:[#allocation5 + $0x60] sm:$0xf] }
  0x38   : > { %291 = vadd.xlane.f32.xlu0 %v1370_v0  ;;  %1003 = vrcp.f32 %v1214_v1  ;;  %v814_v2 = vld [vmem:[#allocation5 + $0x70] sm:$0xf]  ;;  %v903_v3 = vld [vmem:[#allocation5 + $0x74] sm:$0xf0]  ;;  %v902_v4 = vld [vmem:[#allocation5 + $0x74] sm:$0xf] }
  0x39   : > { %v815_v5 = vor.u32 %v903_v3, %v814_v2  ;;  %v816_v6 = vld [vmem:[#allocation5 + $0x78] sm:$0xf0]  ;;  %v901_v8 = vld [vmem:[#allocation5 + $0x64] sm:$0xf0]  ;;  %v900_v10 = vld [vmem:[#allocation5 + $0x64] sm:$0xf] }
  0x3a   : > { %v819_v9 = vor.u32 %v902_v4, %v816_v6  ;;  %v808_v11 = vld [vmem:[#allocation5 + $0x68] sm:$0xf0]  ;;  %v807_v12 = vor.u32 %v901_v8, %v806_v7  ;;  %v798_v24 = vld [vmem:[#allocation5 + $0x50] sm:$0xf]  ;;  %v899_v25 = vld [vmem:[#allocation5 + $0x54] sm:$0xf0] }
  0x3b   : > { %421 = vmatpush.bf16.msra.mxu0 %v815_v5  ;;  %v811_v14 = vor.u32 %v900_v10, %v808_v11  ;;  %v898_v26 = vld [vmem:[#allocation5 + $0x54] sm:$0xf]  ;;  %v799_v27 = vor.u32 %v899_v25, %v798_v24  ;;  %v800_v28 = vld [vmem:[#allocation5 + $0x58] sm:$0xf0]  ;;  %v790_v30 = vld [vmem:[#allocation5 + $0x40] sm:$0xf] }
  0x3c   : > { %434 = vmatpush.bf16.msra.mxu1 %v819_v9  ;;  %v803_v29 = vor.u32 %v898_v26, %v800_v28  ;;  %v897_v31 = vld [vmem:[#allocation5 + $0x44] sm:$0xf0]  ;;  %v896_v32 = vld [vmem:[#allocation5 + $0x44] sm:$0xf]  ;;  %v792_v34 = vld [vmem:[#allocation5 + $0x48] sm:$0xf0] }
  0x3d   : > { %v791_v33 = vor.u32 %v897_v31, %v790_v30  ;;  %v795_v35 = vor.u32 %v896_v32, %v792_v34  ;;  %v782_v36 = vld [vmem:[#allocation5 + $0x30] sm:$0xf]  ;;  %v895_v37 = vld [vmem:[#allocation5 + $0x34] sm:$0xf0]  ;;  %v894_v38 = vld [vmem:[#allocation5 + $0x34] sm:$0xf] }
  0x3e   : > { %v1004_v13 = vpop.eup %1003  ;;  %v783_v39 = vor.u32 %v895_v37, %v782_v36  ;;  %v784_v40 = vld [vmem:[#allocation5 + $0x38] sm:$0xf0]  ;;  %v774_v42 = vld [vmem:[#allocation5 + $0x20] sm:$0xf]  ;;  %v893_v43 = vld [vmem:[#allocation5 + $0x24] sm:$0xf0] }
  0x3f   : > { %v294_v15 = vmul.f32 128.0, %v1004_v13  ;;  %422 = vmatpush.bf16.msra.mxu0 %v807_v12  ;;  %vm298_vm0 = vweird.f32 %v1004_v13  ;;  %v787_v41 = vor.u32 %v894_v38, %v784_v40  ;;  %v892_v44 = vld [vmem:[#allocation5 + $0x24] sm:$0xf]  ;;  %v775_v45 = vor.u32 %v893_v43, %v774_v42  ;;  %v776_v46 = vld [vmem:[#allocation5 + $0x28] sm:$0xf0]  ;;  %v911_v60 = vld [vmem:[#allocation8 + $0x38] sm:$0xff] }
  0x40   : > { %435 = vmatpush.bf16.msra.mxu1 %v811_v14  ;;  %v779_v47 = vor.u32 %v892_v44, %v776_v46  ;;  %v766_v48 = vld [vmem:[#allocation5 + $0x10] sm:$0xf]  ;;  %v891_v49 = vld [vmem:[#allocation5 + $0x14] sm:$0xf0]  ;;  %v890_v50 = vld [vmem:[#allocation5 + $0x14] sm:$0xf]  ;;  %599 = vmatpush.bf16.msra.mxu2 %v911_v60 }
  0x41   : > { %v295_v16 = vsub.f32 1.0, %v294_v15  ;;  %v767_v51 = vor.u32 %v891_v49, %v766_v48  ;;  %v768_v52 = vld [vmem:[#allocation5 + $0x18] sm:$0xf0]  ;;  %v758_v53 = vld [vmem:[#allocation5] sm:$0xf]  ;;  %v910_v11 = vld [vmem:[#allocation8 + $0x30] sm:$0xff] }
  0x42   : > { %v889_v54 = vld [vmem:[#allocation5 + $0x4] sm:$0xf0]  ;;  %v771_v55 = vor.u32 %v890_v50, %v768_v52  ;;  %v888_v56 = vld [vmem:[#allocation5 + $0x4] sm:$0xf]  ;;  %v760_v57 = vld [vmem:[#allocation5 + $0x8] sm:$0xf0] }
  0x43   : > { %v296_v17 = vmul.f32 %v1004_v13, %v295_v16  ;;  %423 = vmatpush.bf16.msra.mxu0 %v799_v27  ;;  %v759_v58 = vor.u32 %v889_v54, %v758_v53  ;;  %v763_v59 = vor.u32 %v888_v56, %v760_v57  ;;  %v919_v61 = vld [vmem:[#allocation8 + $0x78] sm:$0xff]  ;;  %v918_v12 = vld [vmem:[#allocation8 + $0x70] sm:$0xff]  ;;  %v917_v14 = vld [vmem:[#allocation8 + $0x68] sm:$0xff]  ;;  %s885_s26 = sshll.u32 %s1269_s25, 3  ;;  %s289_s27 = scalar_lea.vmem [#allocation10], %s751_s13 }
  0x44   : > { %436 = vmatpush.bf16.msra.mxu1 %v803_v29  ;;  %612 = vmatpush.bf16.msra.mxu3 %v919_v61  ;;  %v908_v15 = vld [vmem:[#allocation8 + $0x20] sm:$0xff]  ;;  %v335_v25 = vld [vmem:[#allocation7] sm:$0x3]  ;;  %v1002_v54 = vld [vmem:[%s1422_s4] ss:$0 sm:$0xff]  ;;  %s638_s22 = scalar_lea.hbm %s1423_s5, %s885_s26  ;;  %s640_s28 = sshll.u32 %s289_s27, 4  ;;  %s641_s28 = int_to_ptr.vmem [resolvable:$true] %s640_s28 }
  0x45   : > { %v297_v18 = vadd.f32 %v1004_v13, %v296_v17  ;;  %600 = vmatpush.bf16.msra.mxu2 %v910_v11  ;;  %v916_v16 = vld [vmem:[#allocation8 + $0x60] sm:$0xff]  ;;  %v907_v17 = vld [vmem:[#allocation8 + $0x18] sm:$0xff]  ;;  %v337_v26 = vperm.slane %v335_v25, 0  ;;  %v338_v27 = vperm.slane %v335_v25, 1  ;;  %s642_s10 = sshll.u32 %s638_s22, 4  ;;  %s628_s25 = scalar_lea.sflag [#allocation4], %s1352_s7  ;;  %s643_s10 = int_to_ptr.hbm [resolvable:$true] %s642_s10 }
  0x46   : > { %v912_v24 = vld [vmem:[#allocation8 + $0x40] sm:$0xff]  ;;  %s1145_s9 = sshra.s32 %s643_s10, 4  ;;  %s1151_s13 = scalar_lea.hbm %s1423_s5, 16  ;;  %s1146_s9 = int_to_ptr.hbm [resolvable:$true] %s1145_s9 }
  0x47   : > { %v299_v19 = vsel %vm298_vm0, %v1004_v13, %v297_v18  ;;  %424 = vmatpush.bf16.msra.mxu0 %v791_v33  ;;  %v909_v13 = vld [vmem:[#allocation8 + $0x28] sm:$0xff]  ;;  %v915_v18 = vld [vmem:[#allocation8 + $0x58] sm:$0xff]  ;;  %s1147_s11 = scalar_lea.hbm %s1146_s9, 8  ;;  %p1152_p12 = scmp.lt.s32.totalorder %s1146_s9, %s1423_s5 }
  0x48   : > { %437 = vmatpush.bf16.msra.mxu1 %v795_v35  ;;  %613 = vmatpush.bf16.msra.mxu3 %v918_v12  ;;  %p1148_p1 = scmp.ne.s32.totalorder %s1146_s9, %s1147_s11  ;;  %p1153_p8 = scmp.lt.s32.totalorder %s1151_s13, %s1147_s11 }
  0x49   : > { %601 = vmatpush.bf16.msra.mxu2 %v909_v13 }
  0x4a   : > { %p1149_p3 = pnand %p1148_p1, %p1321_p13  ;;  %p1154_p7 = por %p1153_p8, %p1152_p12 }
  0x4b   : > { %425 = vmatpush.bf16.msra.mxu0 %v783_v39 }
  0x4c   : > { %438 = vmatpush.bf16.msra.mxu1 %v787_v41  ;;  %614 = vmatpush.bf16.msra.mxu3 %v917_v14  ;;  %p1150_p5 = pneg %p1149_p3 }
  0x4d   : > { %602 = vmatpush.bf16.msra.mxu2 %v908_v15 }
  0x4e   : > { %p1155_p9 = pnand %p1154_p7, %p1150_p5 }
  0x4f   : > { %426 = vmatpush.bf16.msra.mxu0 %v775_v45 }
  0x50   : > { %439 = vmatpush.bf16.msra.mxu1 %v779_v47  ;;  %615 = vmatpush.bf16.msra.mxu3 %v916_v16 }
  0x51   : > { %603 = vmatpush.bf16.msra.mxu2 %v907_v17 }
  0x53   : > { %427 = vmatpush.bf16.msra.mxu0 %v767_v51 }
  0x54   : > { %440 = vmatpush.bf16.msra.mxu1 %v771_v55  ;;  %616 = vmatpush.bf16.msra.mxu3 %v915_v18 }
  0x57   : > { %428 = vmatpush.bf16.msra.mxu0 %v759_v58 }
  0x58   : > { %441 = vmatpush.bf16.msra.mxu1 %v763_v59 }
  0xab   : > { %v292_v20 = vpop.xlane.xlu0 %291 }
  0xac   : > { %v300_v21 = vmul.f32 %v299_v19, %v292_v20  ;;  %v914_v20 = vld [vmem:[#allocation8 + $0x50] sm:$0xff] }
  0xad   : > { %617 = vmatpush.bf16.msra.mxu3 %v914_v20 }
  0xae   : > { %v1374_v22 = vsub.f32 %v1370_v0, %v300_v21  ;;  %v905_v21 = vld [vmem:[#allocation8 + $0x8] sm:$0xff] }
  0xb0   : > { %v302_v23 = vmul.f32 %v1374_v22, %v1374_v22 }
  0xb2   : > { %303 = vadd.xlane.f32.xlu0 %v302_v23  ;;  %v904_v23 = vld [vmem:[#allocation8] sm:$0xff] }
 0x125   : > { %v304_v62 = vpop.xlane.xlu0 %303 }
 0x126   : > { %v305_v63 = vmul.f32 %v304_v62, %v299_v19  ;;  %v906_v19 = vld [vmem:[#allocation8 + $0x10] sm:$0xff] }
 0x127   : > { %604 = vmatpush.bf16.msra.mxu2 %v906_v19 }
 0x128   : > { %v306_v1 = vadd.f32 1e-05, %v305_v63 }
 0x12a   : > { %1005 = vrsqrt.f32 %v306_v1  ;;  %vm313_vm2 = vweird.f32 %v306_v1 }
 0x12b   : > { %605 = vmatpush.bf16.msra.mxu2 %v905_v21 }
 0x12f   : > { %606 = vmatpush.bf16.msra.mxu2 %v904_v23 }
 0x130   : > { %v1006_v2 = vpop.eup %1005 }
 0x131   : > { %v308_v3 = vmul.f32 %v1006_v2, %v306_v1  ;;  %vm314_vm1 = vweird.f32 %v1006_v2 }
 0x132   : > { %vm315_vm3 = vmor %vm313_vm2, %vm314_vm1 }
 0x133   : > { %v309_v4 = vmul.f32 %v1006_v2, %v308_v3 }
 0x135   : > { %v310_v5 = vmul.f32 0.5, %v309_v4 }
 0x137   : > { %v311_v6 = vsub.f32 1.5, %v310_v5 }
 0x139   : > { %v312_v7 = vmul.f32 %v1006_v2, %v311_v6 }
 0x13b   : > { %v316_v8 = vsel %vm315_vm3, %v1006_v2, %v312_v7 }
 0x13c   : > { %v317_v9 = vmul.f32 %v316_v8, %v1374_v22  ;;  %v913_v22 = vld [vmem:[#allocation8 + $0x48] sm:$0xff] }
 0x13d   : > { %618 = vmatpush.bf16.msra.mxu3 %v913_v22 }
 0x13e   : > { %v318_v10 = vpack.c.bf16 %v317_v9, %v317_v9 }
 0x140   : > { %429 = vmatmul.bf16.vlgmr.msra.gmra.mxu0 %v318_v10  ;;  %442 = vmatmul.bf16.vlgmr.msra.gmra.mxu1 %v318_v10 }
 0x141   : > { %619 = vmatpush.bf16.msra.mxu3 %v912_v24 }
 0x1bd   : > { %v430_v28 = vpop.f32.mrf.mxu0  ;;  %v443_v29 = vpop.f32.mrf.mxu1 }
 0x1be   : > { %v431_v30 = vadd.f32 %v430_v28, %v337_v26  ;;  %v444_v31 = vadd.f32 %v443_v29, %v338_v27 }
 0x1c0   : > { %v447_v32 = vmul.f32 %v431_v30, %v431_v30  ;;  %v448_v33 = vmul.f32 %v444_v31, %v444_v31 }
 0x1c2   : > { %v449_v34 = vmul.f32 %v447_v32, %v431_v30  ;;  %v450_v35 = vmul.f32 %v448_v33, %v444_v31 }
 0x1c4   : > { %v451_v36 = vmul.f32 0.044715, %v449_v34  ;;  %v452_v37 = vmul.f32 0.044715, %v450_v35 }
 0x1c5   : > { %v432_v38 = vpop.f32.mrf.mxu0  ;;  %v445_v39 = vpop.f32.mrf.mxu1 }
 0x1c6   : > { %v453_v40 = vadd.f32 %v451_v36, %v431_v30  ;;  %v454_v41 = vadd.f32 %v452_v37, %v444_v31 }
 0x1c8   : > { %v455_v42 = vmul.f32 0.7978846, %v453_v40  ;;  %v456_v43 = vmul.f32 0.7978846, %v454_v41 }
 0x1ca   : > { %1007 = vtanh.f32 %v455_v42 }
 0x1cb   : > { %1009 = vtanh.f32 %v456_v43 }
 0x1d0   : > { %v1008_v44 = vpop.eup %1007 }
 0x1d1   : > { %v1010_v45 = vpop.eup %1009  ;;  %v459_v46 = vadd.f32 1.0, %v1008_v44 }
 0x1d2   : > { %v460_v47 = vadd.f32 1.0, %v1010_v45 }
 0x1d3   : > { %v461_v48 = vmul.f32 0.5, %v459_v46 }
 0x1d4   : > { %v462_v49 = vmul.f32 0.5, %v460_v47 }
 0x1d5   : > { %v463_v50 = vmul.f32 %v461_v48, %v431_v30 }
 0x1d6   : > { %v464_v51 = vmul.f32 %v462_v49, %v444_v31 }
 0x1d7   : > { %v465_v52 = vpack.c.bf16 %v463_v50, %v463_v50 }
 0x1d8   : > { %v466_v53 = vpack.c.bf16 %v464_v51, %v464_v51 }
 0x1d9   : > { %607 = vmatmul.bf16.vlgmr.msra.gmra.mxu2 %v465_v52 }
 0x1da   : > { %620 = vmatmul.bf16.vlgmr.msra.gmra.mxu3 %v466_v53 }
 0x25c   : > { %v608_v55 = vpop.f32.mrf.mxu2 }
 0x25d   : > { %v609_v56 = vadd.f32 %v1002_v54, %v608_v55  ;;  %v621_v57 = vpop.f32.mrf.mxu3 }
 0x25f   : > { %v622_v58 = vadd.f32 %v621_v57, %v609_v56 }
 0x261   : > { %v625_v59 = vadd.f32 %v622_v58, %v1370_v0 }
 0x263   : > { %626 = vst [vmem:[%s289_s27] sm:$0xff] %v625_v59 }
 0x264   : > { %v610_v60 = vpop.f32.mrf.mxu2 }
 0x265   : > { %1158 = shalt.err (!%p1155_p9)
}
 0x266   : > { %934 = dma.vmem_to_hbm [thread:$0]  (%p1321_p13), %s641_s28, 128, %s643_s10, %s628_s25   ;;  %v623_v0 = vpop.f32.mrf.mxu3 }
 0x267 PF: > { %s654_s7 = sand.u32 1, %s1193_s18   ;;  %p1430_p10 = scmp.ge.s32.totalorder %s1205_s21, 2 }
 0x268   : > { %s655_s30 = scalar_lea.sflag [#allocation4], %s654_s7 }
 0x269   : > { %p951_p11 = pnand %p1430_p10, %p1326_p4 }
 0x26b   : > { %p952_p0 = pneg %p951_p11 }
 0x26d   : > { %1188 = dma.done.wait (%p952_p0), %s655_s30, 128  }
 0x26e   : > { %1190 = vsyncadd (%p952_p0), %s655_s30, 4294967168  ;;  %p20_p2 = scmp.ge.s32.totalorder %s1301_s24, 4   ;;  %s1431_s18 = smov %s1197_s19 }
 0x26f   : > { %s1432_s19 = smov %s1201_s20  ;;  %s1433_s20 = smov %s1313_s29 }
 0x270   : > { %s1434_s21 = smov %s1301_s24  ;;  %22 = sbr.rel (!%p20_p2) target bundleno = 7 (0x7), region = 97 }
 0x275   :  { %661 = vsyncpa [#allocation3], 1 }
 0x276   :  { %663 = vsyncpa [#allocation3 + $0x1], 1 }
 0x277   :  { %664 = vsyncpa [#allocation6], 1 }
 0x278   :  { %665 = vsyncpa [#allocation9], 1 }
 0x279   :  { %666 = vsyncpa [#allocation4], 1 }
 0x27a   :  { %668 = vsyncpa [#allocation4 + $0x1], 1 }

</bundles_post_ra>
